<compile_context>
chip_gen: v5e
topology: v5e:2x2
jax: 0.10.0
libtpu: 0.0.40
codegen_flags: <defaults>
</compile_context>

<pallas_src>
import functools

import jax
import jax.numpy as jnp
from jax.experimental import pallas as pl
from jax.experimental.pallas import tpu as pltpu


def _mlp_kernel(seed_ref, x_ref, w1_ref, w2_ref, o_ref, *scratch, p, training):
    # seed_ref: scalar-prefetch (SMEM) int32[1] — only used on the training path.
    # x_ref:  (tb, in_f)   VMEM (resident across out_f and hidden axes)
    # w1_ref: (in_f, th)   VMEM (hidden slab k)
    # w2_ref: (th, tn)     VMEM (hidden slab k, out_f tile j)
    # o_ref:  (tb, tn)     VMEM (resident across the hidden axis)
    # scratch: optional (tb, tn) f32 accumulator (only when o dtype != f32)
    k = pl.program_id(2)
    acc = scratch[0] if scratch else o_ref

    @pl.when(k == 0)
    def _init():
        acc[...] = jnp.zeros_like(acc)

    # fc1 partial (tb, th): native-dtype operands on the MXU, f32 accumulation.
    h = jnp.dot(x_ref[...], w1_ref[...], preferred_element_type=jnp.float32)

    # SiLU: h * sigmoid(h)  (sigmoid lowers to the EUP)
    h = h * jax.nn.sigmoid(h)

    # Dropout (inverted scaling). Only traced when training and p > 0.
    if training and p > 0.0:
        if p >= 1.0:
            h = jnp.zeros_like(h)
        else:
            # TODO(synk): TPU hardware PRNG — matches torch dropout in
            # distribution, not torch's exact RNG stream.  Seed depends only on
            # (batch tile, hidden slab) so the mask is identical across out_f
            # tiles that reuse this hidden slab.
            pltpu.prng_seed(seed_ref[0], pl.program_id(0), k)
            bits = pltpu.prng_random_bits(h.shape)
            if bits.dtype != jnp.uint32:
                bits = pltpu.bitcast(bits, jnp.uint32)
            thresh = jnp.uint32(min(int(p * 4294967296.0), 0xFFFFFFFF))
            inv_keep = jnp.float32(1.0 / (1.0 - p))
            h = jnp.where(bits >= thresh, h * inv_keep, jnp.float32(0.0))

    # fc2 partial: this hidden slab's contribution to the (tb, tn) output tile.
    contrib = jnp.dot(h.astype(w2_ref.dtype), w2_ref[...],
                      preferred_element_type=jnp.float32)

    if scratch:
        acc[...] += contrib

        @pl.when(k == pl.num_programs(2) - 1)
        def _store():
            o_ref[...] = acc[...].astype(o_ref.dtype)
    else:
        # f32 output: accumulate directly into the resident output block.
        o_ref[...] += contrib


def _nbytes(shape, dtype):
    n = 1
    for s in shape:
        n *= int(s)
    return n * jnp.dtype(dtype).itemsize


def _largest_aligned_divisor(total, target, align):
    """Largest d with d | total, d <= target, d % align == 0; None if none."""
    d = min(int(target), int(total))
    d = (d // align) * align
    while d >= align:
        if total % d == 0:
            return d
        d -= align
    return None


def _two_tensorcore_chip():
    # v7x has 2 TensorCores per chip; splitting the parallel batch axis into
    # >=2 tiles lets the grid shard across both.  Best-effort heuristic.
    try:
        kind = jax.devices()[0].device_kind.lower()
        return "v7" in kind
    except Exception:
        return False


def _physical_vmem_bytes():
    phys = 64 << 20  # conservative fallback (v7x per-TC)
    try:
        info = pltpu.get_tpu_info()
        val = getattr(info, "vmem_capacity_bytes", None)
        if val:
            phys = int(val)
    except Exception:
        pass
    return phys


def mlp_forward(x, w1t, w2t, *, p=0.0, training=False, seed=0,
                block_b=None, block_h=None, block_n=None, compute_dtype=None):
    """x: (B, in_f), w1t: (in_f, 4*out_f), w2t: (4*out_f, out_f)."""
    B, in_f = x.shape
    hid = w1t.shape[1]
    out_f = w2t.shape[1]
    assert w1t.shape[0] == in_f and w2t.shape[0] == hid

    out_dtype = x.dtype
    if compute_dtype is not None:
        # e.g. jnp.bfloat16: bf16-native MXU + half the weight HBM traffic,
        # f32 accumulation is kept via preferred_element_type.
        x = x.astype(compute_dtype)
        w1t = w1t.astype(compute_dtype)
        w2t = w2t.astype(compute_dtype)

    acc_in_out = (jnp.dtype(out_dtype) == jnp.dtype(jnp.float32))

    # ---- tile selection -----------------------------------------------------
    # Batch tile: largest divisor of B <= 512 that is a multiple of 8
    # (arithmetic intensity ~= tb FLOP per weight byte; >=512 keeps v6e/v7x
    # MXU-bound), falling back to B for tiny batches.
    if block_b is None:
        tb = _largest_aligned_divisor(B, min(B, 512), 8) or B
        # Prefer >=2 batch tiles on 2-TensorCore chips so the parallel axis
        # actually shards across both cores.
        if _two_tensorcore_chip() and B // tb < 2 and B >= 16:
            alt = _largest_aligned_divisor(B, tb // 2, 8)
            if alt:
                tb = alt
    else:
        tb = block_b
    assert B % tb == 0, "block_b must divide batch"
    assert tb == B or tb % 8 == 0, "block_b must be a multiple of 8 or equal B"

    # Hidden (reduction) tile: up to 1024 (fewer accumulator read-modify-write
    # passes and fewer grid steps), multiple of 128 or the full hidden dim.
    if block_h is None:
        th = _largest_aligned_divisor(hid, min(hid, 1024), 128) or hid
    else:
        th = block_h
    assert hid % th == 0, "block_h must divide the hidden dim"
    assert th == hid or th % 128 == 0, "block_h must be a multiple of 128 or equal hid"

    # out_f tile: up to 2048, multiple of 128 or the full out dim.  Keeps the
    # f32 accumulator + output block within VMEM for large models (v7x).
    if block_n is None:
        tn = _largest_aligned_divisor(out_f, min(out_f, 2048), 128) or out_f
    else:
        tn = block_n
    assert out_f % tn == 0, "block_n must divide out_features"
    assert tn == out_f or tn % 128 == 0, "block_n must be a multiple of 128 or equal out_f"

    # ---- VMEM budget & shrink-to-fit ----------------------------------------
    phys = _physical_vmem_bytes()
    cap = min(100 << 20, int(phys * 0.8))  # ~51 MiB on v7x, up to 100 MiB on v5e/v6e

    def _estimate(tb_, th_, tn_):
        e = 2 * (_nbytes((tb_, in_f), x.dtype)        # double-buffered inputs
                 + _nbytes((in_f, th_), w1t.dtype)
                 + _nbytes((th_, tn_), w2t.dtype)
                 + _nbytes((tb_, tn_), out_dtype))     # double-buffered output
        if not acc_in_out:
            e += _nbytes((tb_, tn_), jnp.float32)      # accumulator scratch
        e += 3 * _nbytes((tb_, th_), jnp.float32)      # h intermediate headroom
        return e

    if block_b is None and block_h is None and block_n is None:
        for _ in range(32):
            if _estimate(tb, th, tn) <= cap:
                break
            nth = _largest_aligned_divisor(hid, th // 2, 128) if th > 128 else None
            if nth and nth < th:
                th = nth
                continue
            ntn = _largest_aligned_divisor(out_f, tn // 2, 128) if tn > 128 else None
            if ntn and ntn < tn:
                tn = ntn
                continue
            ntb = _largest_aligned_divisor(B, tb // 2, 8) if tb > 8 else None
            if ntb and ntb < tb:
                tb = ntb
                continue
            break

    est = _estimate(tb, th, tn)
    vmem_limit = int(min(max(int(1.3 * est), cap), phys))

    nb, nn, nk = B // tb, out_f // tn, hid // th
    grid = (nb, nn, nk)

    kernel = functools.partial(_mlp_kernel, p=float(p), training=bool(training))
    seed_arr = jnp.array([seed], dtype=jnp.int32)

    scratch_shapes = [] if acc_in_out else [pltpu.VMEM((tb, tn), jnp.float32)]

    grid_spec = pltpu.PrefetchScalarGridSpec(
        num_scalar_prefetch=1,
        grid=grid,
        in_specs=[
            pl.BlockSpec((tb, in_f), lambda i, j, k, s: (i, 0)),
            pl.BlockSpec((in_f, th), lambda i, j, k, s: (0, k)),
            pl.BlockSpec((th, tn), lambda i, j, k, s: (k, j)),
        ],
        out_specs=pl.BlockSpec((tb, tn), lambda i, j, k, s: (i, j)),
        scratch_shapes=scratch_shapes,
    )

    # HBM traffic: x resident per batch tile (block index constant over j,k),
    # w1 re-streamed per (batch tile, out_f tile), w2 re-streamed per batch
    # tile, output written once.
    cost = pl.CostEstimate(
        flops=2 * B * in_f * hid * nn + 2 * B * hid * out_f,
        transcendentals=B * hid * nn,
        bytes_accessed=(_nbytes((B, in_f), x.dtype)
                        + nb * nn * _nbytes((in_f, hid), w1t.dtype)
                        + nb * _nbytes((hid, out_f), w2t.dtype)
                        + _nbytes((B, out_f), out_dtype)),
    )

    return pl.pallas_call(
        kernel,
        out_shape=jax.ShapeDtypeStruct((B, out_f), out_dtype),
        grid_spec=grid_spec,
        compiler_params=pltpu.CompilerParams(
            dimension_semantics=("parallel", "parallel", "arbitrary"),
            vmem_limit_bytes=vmem_limit),
        cost_estimate=cost,
    )(seed_arr, x, w1t, w2t)


if __name__ == "__main__":
    # Module config: in_features=32, out_features=32 -> hidden = 4*32 = 128.
    # NOTE: at these toy shapes the kernel is step-overhead bound; the tiling
    # logic above is what matters for realistic (large D/H/B) shapes.
    in_features = 32
    out_features = 32
    hidden = 4 * out_features
    batch = 8
    dropout_p = 0.1  # nn.Dropout(p)

    key = jax.random.PRNGKey(0)
    kx, k1, k2 = jax.random.split(key, 3)

    x = jax.random.normal(kx, (batch, in_features), dtype=jnp.float32)
    # PyTorch fc1.weight: (hidden, in_features); fc2.weight: (out_features, hidden)
    w1 = jax.random.normal(k1, (hidden, in_features), dtype=jnp.float32) * 0.05
    w2 = jax.random.normal(k2, (out_features, hidden), dtype=jnp.float32) * 0.05
    # Pre-transpose so the kernel does x @ W^T as a plain row-major matmul.
    w1t = w1.T  # (in_features, hidden)
    w2t = w2.T  # (hidden, out_features)

    # Eval-mode forward (dropout = identity), matching module.eval() semantics.
    y = mlp_forward(x, w1t, w2t, p=dropout_p, training=False)
    y = jax.block_until_ready(y)

    # Pure-JAX reference.
    h_ref = x @ w1t
    h_ref = h_ref * jax.nn.sigmoid(h_ref)
    y_ref = h_ref @ w2t

    assert y.shape == (batch, out_features)
    assert jnp.allclose(y, y_ref, atol=1e-5, rtol=1e-5), (
        float(jnp.max(jnp.abs(y - y_ref))))

    # Training-path smoke test only on real TPU hardware: the dropout mask uses
    # the TPU hardware PRNG (pltpu.prng_seed / prng_random_bits), which has no
    # CPU-interpreter lowering.
    if jax.devices()[0].platform == "tpu":
        y_tr = mlp_forward(x, w1t, w2t, p=dropout_p, training=True, seed=123)
        y_tr = jax.block_until_ready(y_tr)
        assert y_tr.shape == (batch, out_features)
        assert bool(jnp.all(jnp.isfinite(y_tr)))

    print("KERNEL_OK")
</pallas_src>

<mosaic_0001>
module attributes {stable_mosaic.version = 11 : i64} {
  func.func @_mlp_kernel(%arg0: i32, %arg1: i32, %arg2: i32, %arg3: memref<1xi32, #tpu.memory_space<smem>>, %arg4: memref<8x32xf32, #tpu.memory_space<vmem>>, %arg5: memref<32x128xf32, #tpu.memory_space<vmem>>, %arg6: memref<128x32xf32, #tpu.memory_space<vmem>>, %arg7: memref<8x32xf32, #tpu.memory_space<vmem>>) attributes {dimension_semantics = [#tpu.dimension_semantics<parallel>, #tpu.dimension_semantics<parallel>, #tpu.dimension_semantics<arbitrary>], iteration_bounds = array<i64: 1, 1, 1>, scalar_prefetch = 1 : i64, scratch_operands = 0 : i64, tpu.core_type = #tpu.core_type<tc>, window_params = [{transform_indices = @transform_0, window_bounds = array<i64: 8, 32>}, {transform_indices = @transform_1, window_bounds = array<i64: 32, 128>}, {transform_indices = @transform_2, window_bounds = array<i64: 128, 32>}, {transform_indices = @transform_3, window_bounds = array<i64: 8, 32>}]} {
    %c0_i32 = arith.constant 0 : i32
    %0 = arith.cmpi eq, %arg2, %c0_i32 : i32
    %1 = arith.extui %0 : i1 to i32
    %c0_i32_0 = arith.constant 0 : i32
    %2 = arith.cmpi ne, %1, %c0_i32_0 : i32
    scf.if %2 {
      %cst_12 = arith.constant 0.000000e+00 : f32
      %17 = vector.broadcast %cst_12 : f32 to vector<8x32xf32>
      %c0_13 = arith.constant 0 : index
      %c0_14 = arith.constant 0 : index
      %18 = vector.load %arg7[%c0_13, %c0_14] : memref<8x32xf32, #tpu.memory_space<vmem>>, vector<8x32xf32>
      tpu.vector_store %arg7[%c0_13, %c0_14], %17 {strides = array<i32>} : memref<8x32xf32, #tpu.memory_space<vmem>>, vector<8x32xf32>,
    } else {
    }
    %c0 = arith.constant 0 : index
    %c0_1 = arith.constant 0 : index
    %3 = vector.load %arg4[%c0, %c0_1] : memref<8x32xf32, #tpu.memory_space<vmem>>, vector<8x32xf32>
    %c0_2 = arith.constant 0 : index
    %c0_3 = arith.constant 0 : index
    %4 = vector.load %arg5[%c0_2, %c0_3] : memref<32x128xf32, #tpu.memory_space<vmem>>, vector<32x128xf32>
    %cst = arith.constant dense<0.000000e+00> : vector<8x128xf32>
    %5 = tpu.matmul %3, %4, %cst {dimension_numbers = #tpu.dot_dimension_numbers<[1], [0], [0], [1], [0, 0, 1, 1], [], []>} : vector<8x32xf32>, vector<32x128xf32>, vector<8x128xf32> -> vector<8x128xf32>
    %6 = arith.negf %5 : vector<8x128xf32>
    %7 = math.exp %6 : vector<8x128xf32>
    %cst_4 = arith.constant 1.000000e+00 : f32
    %8 = vector.broadcast %cst_4 : f32 to vector<8x128xf32>
    %9 = arith.addf %8, %7 : vector<8x128xf32>
    %10 = arith.divf %8, %9 : vector<8x128xf32>
    %11 = arith.mulf %5, %10 : vector<8x128xf32>
    %c0_5 = arith.constant 0 : index
    %c0_6 = arith.constant 0 : index
    %12 = vector.load %arg6[%c0_5, %c0_6] : memref<128x32xf32, #tpu.memory_space<vmem>>, vector<128x32xf32>
    %cst_7 = arith.constant dense<0.000000e+00> : vector<8x32xf32>
    %13 = tpu.matmul %11, %12, %cst_7 {dimension_numbers = #tpu.dot_dimension_numbers<[1], [0], [0], [1], [0, 0, 1, 1], [], []>} : vector<8x128xf32>, vector<128x32xf32>, vector<8x32xf32> -> vector<8x32xf32>
    %c0_8 = arith.constant 0 : index
    %c0_9 = arith.constant 0 : index
    %14 = vector.load %arg7[%c0_8, %c0_9] : memref<8x32xf32, #tpu.memory_space<vmem>>, vector<8x32xf32>
    %15 = arith.addf %14, %13 : vector<8x32xf32>
    %c0_10 = arith.constant 0 : index
    %c0_11 = arith.constant 0 : index
    %16 = vector.load %arg7[%c0_10, %c0_11] : memref<8x32xf32, #tpu.memory_space<vmem>>, vector<8x32xf32>
    tpu.vector_store %arg7[%c0_10, %c0_11], %15 {strides = array<i32>} : memref<8x32xf32, #tpu.memory_space<vmem>>, vector<8x32xf32>,
    return
  }
  func.func @transform_0(%arg0: i32, %arg1: i32, %arg2: i32, %arg3: memref<1xi32, #tpu.memory_space<smem>>) -> (i32, i32) {
    %c0_i32 = arith.constant 0 : i32
    %c0_i32_0 = arith.constant 0 : i32
    return %arg0, %c0_i32 : i32, i32
  }
  func.func @transform_1(%arg0: i32, %arg1: i32, %arg2: i32, %arg3: memref<1xi32, #tpu.memory_space<smem>>) -> (i32, i32) {
    %c0_i32 = arith.constant 0 : i32
    %c0_i32_0 = arith.constant 0 : i32
    return %c0_i32, %arg2 : i32, i32
  }
  func.func @transform_2(%arg0: i32, %arg1: i32, %arg2: i32, %arg3: memref<1xi32, #tpu.memory_space<smem>>) -> (i32, i32) {
    %c0_i32 = arith.constant 0 : i32
    return %arg2, %arg1 : i32, i32
  }
  func.func @transform_3(%arg0: i32, %arg1: i32, %arg2: i32, %arg3: memref<1xi32, #tpu.memory_space<smem>>) -> (i32, i32) {
    %c0_i32 = arith.constant 0 : i32
    return %arg0, %arg1 : i32, i32
  }
}

</mosaic_0001>

<bundles_post_ra>
// kernel: tpu_custom_call.1
= control target key start
LH: loop header
LB: loop body
LE: loop exit
PB: predicated region body
PF: predicated region fallthrough
CT: control target
= control target key end

     0   :  { %vm21_vm0 = vcmask 261120   ;;  %v161_v2 = vmov 0.0   ;;  %s257_s0 = inlined_call_operand.<no memory space> [shape: s32[1], index: 0, kind: input, shape index: {}]   ;;  %s258_s1 = inlined_call_operand.vmem [shape: f32[8,32], index: 1, kind: input, shape index: {}]   ;;  %s259_s2 = inlined_call_operand.vmem [shape: f32[32,128], index: 2, kind: input, shape index: {}]   ;;  %s260_s3 = inlined_call_operand.vmem [shape: f32[128,32], index: 3, kind: input, shape index: {}]   ;;  %s261_s4 = inlined_call_operand.hbm [shape: f32[8,32], index: 4, kind: output, shape index: {}]  }
   0x1   :  { %v27_v0 = vld [vmem:[%s259_s2 + $0x18] sm:$0xff]  ;;  %v26_v1 = vld [vmem:[%s259_s2 + $0x10] sm:$0xff]  ;;  %22 = vst.msk [vmem:[#allocation4] sm:$0xff] %vm21_vm0, %v161_v2 }
   0x2   :  { %44 = vmatpush.msra.mxu0 %v27_v0 }
   0x3   :  { %10 = vsyncpa [#allocation5], 0  ;;  %v25_v3 = vld [vmem:[%s259_s2 + $0x8] sm:$0xff]  ;;  %v24_v4 = vld [vmem:[%s259_s2] sm:$0xff]  ;;  %s118_s29 = sshll.u32 %s261_s4, 4  ;;  %s119_s29 = int_to_ptr.hbm [resolvable:$true] %s118_s29 }
   0x4   :  { %45 = vmatpush.msra.mxu0 %v26_v1  ;;  %v23_v5 = vld [vmem:[%s258_s1] sm:$0xff]  ;;  %v87_v6 = vld [vmem:[%s260_s3 + $0x78] sm:$0xff]  ;;  %v86_v7 = vld [vmem:[%s260_s3 + $0x70] sm:$0xff] }
   0x5   :  { %88 = vmatpush.msra.mxu1 %v87_v6  ;;  %v85_v8 = vld [vmem:[%s260_s3 + $0x68] sm:$0xff]  ;;  %v84_v9 = vld [vmem:[%s260_s3 + $0x60] sm:$0xff]  ;;  %v83_v10 = vld [vmem:[%s260_s3 + $0x58] sm:$0xff] }
   0x6   :  { %46 = vmatpush.msra.mxu0 %v25_v3  ;;  %v82_v11 = vld [vmem:[%s260_s3 + $0x50] sm:$0xff]  ;;  %v81_v12 = vld [vmem:[%s260_s3 + $0x48] sm:$0xff]  ;;  %v80_v13 = vld [vmem:[%s260_s3 + $0x40] sm:$0xff] }
   0x7   :  { %89 = vmatpush.msra.mxu1 %v86_v7  ;;  %v79_v14 = vld [vmem:[%s260_s3 + $0x38] sm:$0xff]  ;;  %v78_v15 = vld [vmem:[%s260_s3 + $0x30] sm:$0xff]  ;;  %v77_v16 = vld [vmem:[%s260_s3 + $0x28] sm:$0xff] }
   0x8   :  { %47 = vmatpush.msra.mxu0 %v24_v4  ;;  %v76_v17 = vld [vmem:[%s260_s3 + $0x20] sm:$0xff]  ;;  %v75_v18 = vld [vmem:[%s260_s3 + $0x18] sm:$0xff]  ;;  %v74_v19 = vld [vmem:[%s260_s3 + $0x10] sm:$0xff] }
   0x9   :  { %127 = vmatmul.msk.f32.vlgmr.msra.gmra.mxu0 %vm21_vm0, %v23_v5  ;;  %90 = vmatpush.msra.mxu1 %v85_v8  ;;  %v73_v20 = vld [vmem:[%s260_s3 + $0x8] sm:$0xff]  ;;  %v72_v21 = vld [vmem:[%s260_s3] sm:$0xff]  ;;  %s162_s3 = smov [#allocation4]  }
   0xa   :  { %v108_v37 = vld [vmem:[#allocation4] sm:$0xff]  ;;  %s116_s27 = sshll.u32 %s162_s3, 4  ;;  %s117_s27 = int_to_ptr.vmem [resolvable:$true] %s116_s27 }
   0xb   :  { %91 = vmatpush.msra.mxu1 %v84_v9 }
   0xd   :  { %92 = vmatpush.msra.mxu1 %v83_v10 }
   0xf   :  { %93 = vmatpush.msra.mxu1 %v82_v11 }
  0x11   :  { %94 = vmatpush.msra.mxu1 %v81_v12 }
  0x13   :  { %95 = vmatpush.msra.mxu1 %v80_v13 }
  0x15   :  { %96 = vmatpush.msra.mxu1 %v79_v14 }
  0x17   :  { %97 = vmatpush.msra.mxu1 %v78_v15 }
  0x19   :  { %98 = vmatpush.msra.mxu1 %v77_v16 }
  0x1b   :  { %99 = vmatpush.msra.mxu1 %v76_v17 }
  0x1d   :  { %100 = vmatpush.msra.mxu1 %v75_v18 }
  0x1f   :  { %101 = vmatpush.msra.mxu1 %v74_v19 }
  0x21   :  { %102 = vmatpush.msra.mxu1 %v73_v20 }
  0x23   :  { %103 = vmatpush.msra.mxu1 %v72_v21 }
  0x86   :  { %v49_v22 = vpop.f32.mrf.mxu0 }
  0x87   :  { %v128_v23 = vmul.f32 -1.442695, %v49_v22 }
  0x89   :  { %131 = vpow2.f32 %v128_v23 }
  0x8f   :  { %v132_v24 = vpop.eup %131 }
  0x90   :  { %v55_v25 = vadd.f32 1.0, %v132_v24 }
  0x92   :  { %133 = vrcp.f32 %v55_v25  ;;  %v67_v29 = vand.u32 2147483648, %v55_v25  ;;  %v65_v31 = vand.u32 2147483647, %v55_v25  ;;  %vm61_vm2 = vweird.f32 %v55_v25 }
  0x94   :  { %v68_v33 = vor.u32 1.1754944e-38, %v67_v29  ;;  %vm66_vm4 = vcmp.eq.f32.partialorder %v65_v31, 8.507059e+37 }
  0x98   :  { %v134_v26 = vpop.eup %133 }
  0x99   :  { %v57_v27 = vmul.f32 %v134_v26, %v55_v25  ;;  %vm62_vm1 = vweird.f32 %v134_v26 }
  0x9a   :  { %vm63_vm3 = vmor %vm61_vm2, %vm62_vm1 }
  0x9b   :  { %v58_v28 = vsub.f32 1.0, %v57_v27 }
  0x9d   :  { %v59_v30 = vmul.f32 %v134_v26, %v58_v28 }
  0x9f   :  { %v60_v32 = vadd.f32 %v134_v26, %v59_v30 }
  0xa1   :  { %v64_v34 = vsel %vm63_vm3, %v134_v26, %v60_v32 }
  0xa2   :  { %v69_v35 = vsel %vm66_vm4, %v68_v33, %v64_v34 }
  0xa3   :  { %v71_v36 = vmul.f32 %v69_v35, %v49_v22 }
  0xa5   :  { %104 = vmatmul.f32.vlgmr.msra.gmra.mxu1 %v71_v36 }
 0x122   :  { %v105_v38 = vpop.f32.mrf.mxu1 }
 0x123   :  { %v109_v39 = vadd.f32 %v108_v37, %v105_v38 }
 0x125   :  { %110 = vst.msk [vmem:[#allocation4] sm:$0xff] %vm21_vm0, %v109_v39 }
 0x126   :  { %121 = dma.vmem_to_hbm [thread:$0]  %s117_s27, 128, %s119_s29, [#allocation5]  }
 0x127   :  { %159 = dma.done.wait [#allocation5], 128  }
 0x128   :  { %160 = vsyncadd [#allocation5], 4294967168 }
 0x129   :  { %126 = vsyncpa [#allocation5], 1 }

</bundles_post_ra>
